<compile_context>
chip_gen: v7x
topology: tpu7x:2x2x1
jax: 0.10.0
libtpu: 0.0.40
codegen_flags: <defaults>
</compile_context>

<pallas_src>
import functools

import jax
import jax.numpy as jnp
import numpy as np
from jax.experimental import pallas as pl
from jax.experimental.pallas import tpu as pltpu


# ----------------------------- Pallas kernel ------------------------------ #

def _ln2d_kernel(x_ref, w_ref, b_ref, o_ref, *, eps):
    """Channel LayerNorm on one (BN, C, TL) tile.

    x_ref : (BN, C, TL)  activation tile; lane dim = flattened spatial tile
    w_ref : (C, 1)       per-channel scale
    b_ref : (C, 1)       per-channel shift
    o_ref : (BN, C, TL)  output tile
    """
    x = x_ref[...].astype(jnp.float32)                 # (BN, C, TL)
    c = x.shape[1]
    inv_c = jnp.float32(1.0 / c)

    # mean / biased variance over the channel axis (non-lane axis -> cheap).
    u = jnp.sum(x, axis=1, keepdims=True) * inv_c      # (BN, 1, TL)
    d = x - u
    s = jnp.sum(d * d, axis=1, keepdims=True) * inv_c  # (BN, 1, TL)
    inv_std = jax.lax.rsqrt(s + jnp.float32(eps))      # EUP slot, ~free

    w = w_ref[...].astype(jnp.float32)[None]           # (1, C, 1)
    b = b_ref[...].astype(jnp.float32)[None]           # (1, C, 1)
    y = d * (inv_std * w) + b                          # broadcast over lanes
    o_ref[...] = y.astype(o_ref.dtype)


# ----------------------------- tile selection ------------------------------ #

def _select_tiles(N, C, L, itemsize,
                  lane_tile_max=2048,
                  block_budget_bytes=2 * 1024 * 1024,
                  min_grid_steps=2):
    """Pick (BN, TL): batch-per-step and 128-multiple lane tile.

    Guarantees: TL is a multiple of 128 (or the full, always-legal L);
    one (BN, C, TL) block stays under `block_budget_bytes` whenever a single
    (C, 128) slab does; the grid has >= `min_grid_steps` steps when possible
    (so both v7x TensorCores get work).
    """
    if L % 128 == 0:
        TL = min(L, lane_tile_max)
        # shrink if a single-image slab alone blows the budget (huge C)
        while TL > 128 and C * TL * itemsize > block_budget_bytes:
            TL = max(128, ((TL // 2) // 128) * 128)
    else:
        TL = L  # full extent is always a legal lane width

    per_image = max(C * TL * itemsize, 1)
    BN = int(max(1, min(N, block_budget_bytes // per_image)))

    def steps(bn, tl):
        return pl.cdiv(N, bn) * pl.cdiv(L, tl)

    # Keep at least `min_grid_steps` grid steps: shrink BN first, then lanes.
    while BN > 1 and steps(BN, TL) < min_grid_steps:
        BN //= 2
    if steps(BN, TL) < min_grid_steps and TL % 256 == 0 and TL > 128:
        TL //= 2
    return BN, TL


# -------------------------------- wrapper ---------------------------------- #

def layernorm2d_pallas(x, weight, bias, eps=1e-6):
    """x: (N, C, H, W); weight, bias: (C,).  Returns (N, C, H, W)."""
    N, C, H, W = x.shape
    L = H * W
    xf = x.reshape(N, C, L)           # contiguous reshape, no data movement

    BN, TL = _select_tiles(N, C, L, x.dtype.itemsize)
    grid = (pl.cdiv(N, BN), pl.cdiv(L, TL))

    kern = functools.partial(_ln2d_kernel, eps=eps)
    out = pl.pallas_call(
        kern,
        out_shape=jax.ShapeDtypeStruct((N, C, L), x.dtype),
        grid_spec=pltpu.PrefetchScalarGridSpec(
            num_scalar_prefetch=0,
            grid=grid,
            in_specs=[
                pl.BlockSpec((BN, C, TL), lambda n, l: (n, 0, l)),
                pl.BlockSpec((C, 1), lambda n, l: (0, 0)),
                pl.BlockSpec((C, 1), lambda n, l: (0, 0)),
            ],
            out_specs=pl.BlockSpec((BN, C, TL), lambda n, l: (n, 0, l)),
        ),
        compiler_params=pltpu.CompilerParams(
            dimension_semantics=("parallel", "parallel")),
    )(xf, weight.reshape(C, 1), bias.reshape(C, 1))
    return out.reshape(N, C, H, W)


# ------------------------------ reference ---------------------------------- #

def layernorm2d_ref(x, weight, bias, eps=1e-6):
    u = jnp.mean(x, axis=1, keepdims=True)
    s = jnp.mean((x - u) ** 2, axis=1, keepdims=True)
    xn = (x - u) / jnp.sqrt(s + eps)
    return weight[None, :, None, None] * xn + bias[None, :, None, None]


# ---------------------------------- main ----------------------------------- #

if __name__ == "__main__":
    key = jax.random.PRNGKey(0)

    configs = [
        # (N, C, H, W)
        (2, 4, 16, 16),    # tiny C, 128-aligned L
        (2, 32, 16, 16),   # typical small feature map
        (2, 8, 14, 14),    # L % 128 != 0 -> full-extent lane path
        (1, 16, 32, 32),   # single image -> lane split for 2 grid steps
    ]

    for N, C, H, W in configs:
        key, kx, kw, kb = jax.random.split(key, 4)
        x = jax.random.normal(kx, (N, C, H, W), jnp.float32)
        # PyTorch init is weight=1, bias=0; use non-trivial values so the
        # affine path is actually exercised.
        weight = 1.0 + 0.1 * jax.random.normal(kw, (C,), jnp.float32)
        bias = 0.1 * jax.random.normal(kb, (C,), jnp.float32)

        out = layernorm2d_pallas(x, weight, bias, eps=1e-6)
        out = jax.block_until_ready(out)
        assert out.shape == (N, C, H, W), out.shape

        ref = layernorm2d_ref(x, weight, bias, eps=1e-6)
        np.testing.assert_allclose(np.asarray(out), np.asarray(ref),
                                   rtol=1e-5, atol=1e-5)

    print("KERNEL_OK")
</pallas_src>

<mosaic_0001>
module attributes {stable_mosaic.version = 11 : i64} {
  func.func @_ln2d_kernel(%arg0: i32, %arg1: i32, %arg2: memref<1x4x256xf32, #tpu.memory_space<vmem>>, %arg3: memref<4x1xf32, #tpu.memory_space<vmem>>, %arg4: memref<4x1xf32, #tpu.memory_space<vmem>>, %arg5: memref<1x4x256xf32, #tpu.memory_space<vmem>>) attributes {dimension_semantics = [#tpu.dimension_semantics<parallel>, #tpu.dimension_semantics<parallel>], iteration_bounds = array<i64: 2, 1>, scalar_prefetch = 0 : i64, scratch_operands = 0 : i64, tpu.core_type = #tpu.core_type<tc>, window_params = [{transform_indices = @transform_0, window_bounds = array<i64: 1, 4, 256>}, {pipeline_mode = #tpu.pipeline_mode<synchronous>, transform_indices = @transform_1, window_bounds = array<i64: 4, 1>}, {pipeline_mode = #tpu.pipeline_mode<synchronous>, transform_indices = @transform_2, window_bounds = array<i64: 4, 1>}, {transform_indices = @transform_3, window_bounds = array<i64: 1, 4, 256>}]} {
    %c0 = arith.constant 0 : index
    %c0_0 = arith.constant 0 : index
    %c0_1 = arith.constant 0 : index
    %0 = vector.load %arg2[%c0, %c0_0, %c0_1] : memref<1x4x256xf32, #tpu.memory_space<vmem>>, vector<1x4x256xf32>
    %cst = arith.constant dense<0.000000e+00> : vector<1x256xf32>
    %1 = vector.multi_reduction <add>, %0, %cst [1] : vector<1x4x256xf32> to vector<1x256xf32>
    %2 = vector.shape_cast %1 : vector<1x256xf32> to vector<1x1x256xf32>
    %cst_2 = arith.constant 2.500000e-01 : f32
    %3 = vector.broadcast %cst_2 : f32 to vector<1x1x256xf32>
    %4 = arith.mulf %2, %3 : vector<1x1x256xf32>
    %5 = vector.broadcast %4 : vector<1x1x256xf32> to vector<1x4x256xf32>
    %6 = arith.subf %0, %5 : vector<1x4x256xf32>
    %7 = arith.mulf %6, %6 : vector<1x4x256xf32>
    %cst_3 = arith.constant dense<0.000000e+00> : vector<1x256xf32>
    %8 = vector.multi_reduction <add>, %7, %cst_3 [1] : vector<1x4x256xf32> to vector<1x256xf32>
    %9 = vector.shape_cast %8 : vector<1x256xf32> to vector<1x1x256xf32>
    %cst_4 = arith.constant 2.500000e-01 : f32
    %10 = vector.broadcast %cst_4 : f32 to vector<1x1x256xf32>
    %11 = arith.mulf %9, %10 : vector<1x1x256xf32>
    %cst_5 = arith.constant 9.99999997E-7 : f32
    %12 = vector.broadcast %cst_5 : f32 to vector<1x1x256xf32>
    %13 = arith.addf %11, %12 : vector<1x1x256xf32>
    %14 = math.rsqrt %13 : vector<1x1x256xf32>
    %c0_6 = arith.constant 0 : index
    %c0_7 = arith.constant 0 : index
    %15 = vector.load %arg3[%c0_6, %c0_7] : memref<4x1xf32, #tpu.memory_space<vmem>>, vector<4x1xf32>
    %16 = vector.shape_cast %15 : vector<4x1xf32> to vector<1x4x1xf32>
    %c0_8 = arith.constant 0 : index
    %c0_9 = arith.constant 0 : index
    %17 = vector.load %arg4[%c0_8, %c0_9] : memref<4x1xf32, #tpu.memory_space<vmem>>, vector<4x1xf32>
    %18 = vector.shape_cast %17 : vector<4x1xf32> to vector<1x4x1xf32>
    %19 = vector.broadcast %14 : vector<1x1x256xf32> to vector<1x4x256xf32>
    %20 = vector.broadcast %16 : vector<1x4x1xf32> to vector<1x4x256xf32>
    %21 = arith.mulf %19, %20 : vector<1x4x256xf32>
    %22 = arith.mulf %6, %21 : vector<1x4x256xf32>
    %23 = vector.broadcast %18 : vector<1x4x1xf32> to vector<1x4x256xf32>
    %24 = arith.addf %22, %23 : vector<1x4x256xf32>
    %c0_10 = arith.constant 0 : index
    %c0_11 = arith.constant 0 : index
    %c0_12 = arith.constant 0 : index
    %25 = vector.load %arg5[%c0_10, %c0_11, %c0_12] : memref<1x4x256xf32, #tpu.memory_space<vmem>>, vector<1x4x256xf32>
    tpu.vector_store %arg5[%c0_10, %c0_11, %c0_12], %24 {strides = array<i32>} : memref<1x4x256xf32, #tpu.memory_space<vmem>>, vector<1x4x256xf32>,
    return
  }
  func.func @transform_0(%arg0: i32, %arg1: i32) -> (i32, i32, i32) {
    %c0_i32 = arith.constant 0 : i32
    %c0_i32_0 = arith.constant 0 : i32
    return %arg0, %c0_i32, %arg1 : i32, i32, i32
  }
  func.func @transform_1(%arg0: i32, %arg1: i32) -> (i32, i32) {
    %c0_i32 = arith.constant 0 : i32
    %c0_i32_0 = arith.constant 0 : i32
    %c0_i32_1 = arith.constant 0 : i32
    return %c0_i32, %c0_i32_0 : i32, i32
  }
  func.func @transform_2(%arg0: i32, %arg1: i32) -> (i32, i32) {
    %c0_i32 = arith.constant 0 : i32
    %c0_i32_0 = arith.constant 0 : i32
    %c0_i32_1 = arith.constant 0 : i32
    return %c0_i32, %c0_i32_0 : i32, i32
  }
  func.func @transform_3(%arg0: i32, %arg1: i32) -> (i32, i32, i32) {
    %c0_i32 = arith.constant 0 : i32
    %c0_i32_0 = arith.constant 0 : i32
    return %arg0, %c0_i32, %arg1 : i32, i32, i32
  }
}

</mosaic_0001>

<bundles_post_ra>
// kernel: tpu_custom_call.1
= control target key start
LH: loop header
LB: loop body
LE: loop exit
PB: predicated region body
PF: predicated region fallthrough
CT: control target
= control target key end

     0   :  { %8 = vsyncpa [#allocation3], 0  ;;  %s797_s0 = inlined_call_operand.hbm [shape: f32[2,4,256], index: 0, kind: input, shape index: {}]   ;;  %s798_s1 = inlined_call_operand.vmem [shape: f32[4,1], index: 1, kind: input, shape index: {}]   ;;  %s799_s2 = inlined_call_operand.vmem [shape: f32[4,1], index: 2, kind: input, shape index: {}]   ;;  %s800_s3 = inlined_call_operand.hbm [shape: f32[2,4,256], index: 3, kind: output, shape index: {}]  }
   0x1   :  { %10 = vsyncpa [#allocation3 + $0x1], 0 }
   0x2   :  { %11 = vsyncpa [#allocation4], 0 }
   0x3   :  { %13 = vsyncpa [#allocation4 + $0x1], 0  ;;  %s611_s12 = smov 0   ;;  %s613_s13 = smov 0  }
   0x4   :  { %s615_s14 = smov 0   ;;  %s617_s15 = smov 0  }
   0x5   :  { %s619_s16 = smov 0   ;;  %s621_s17 = smov 0  }
   0x6 LB: > { %s386_s18 = sadd.s32 4294967295, %s585_s17   ;;  %s387_s19 = sadd.s32 4294967294, %s585_s17   ;;  %s585_s17 = sphi %s621_s17, %s19_s17   ;;  %s581_s16 = sphi %s619_s16, %s816_s16   ;;  %s577_s15 = sphi %s617_s15, %s815_s15   ;;  %s573_s14 = sphi %s615_s14, %s814_s14   ;;  %s569_s13 = sphi %s613_s13, %s813_s13   ;;  %s565_s12 = sphi %s611_s12, %s812_s12  }
   0x7   : > { %s31_s20 = sadd.s32 1, %s581_s16  ;;  %s40_s21 = sadd.s32 1, %s573_s14 }
   0x8   : > { %p33_p0 = scmp.ge.s32.totalorder %s31_s20, 2  ;;  %p47_p1 = scmp.ne.s32.totalorder %s573_s14, %s569_s13 }
   0x9   : > { %p48_p2 = scmp.eq.s32.totalorder %s585_s17, 0  ;;  %p53_p3 = scmp.ne.s32.totalorder %s569_s13, %s565_s12 }
   0xa   : > { %s818_s20 = smov (%p33_p0, %s31_s20), 0  ;;  %p54_p5 = scmp.eq.s32.totalorder %s386_s18, 0 }
   0xb   : > { %p652_p4 = por %p48_p2, %p47_p1  ;;  %s35_s23 = ssub.s32 %s581_s16, %s818_s20 }
   0xc   : > { %p121_p6 = scmp.eq.s32.totalorder %s386_s18, 1  ;;  %p38_p7 = scmp.eq.s32.totalorder %s35_s23, 0 }
   0xd   : > { %p658_p8 = por %p54_p5, %p53_p3  ;;  %p127_p10 = scmp.eq.s32.totalorder %s387_s19, 1 }
   0xe   : > { %p662_p9 = por %p121_p6, %p47_p1  ;;  %p415_p13 = scmp.lt.s32.totalorder %s585_s17, 2 }
   0xf   : > { %s667_s26 = scalar_select %p38_p7, %s573_s14, %s40_s21  }
  0x10   : > { %s804_s25 = scalar_select %p662_p9, 1, 0 }
  0x11   : > { %p669_p11 = por %p127_p10, %p53_p3  ;;  %s153_s28 = sand.u32 1, %s573_s14  }
  0x12   : > { %s390_s29 = sshll.u32 %s153_s28, 3  ;;  %s401_s30 = sshll.u32 %s581_s16, 7 }
  0x13   : > { %s805_s27 = scalar_select %p669_p11, 1, 0 }
  0x14   : > { %s680_s6 = scalar_lea.hbm %s797_s0, %s401_s30  ;;  %s157_s7 = scalar_lea.vmem [#allocation2], %s390_s29 }
  0x15   : > { %s167_s8 = sshll.u32 %s157_s7, 4  ;;  %p686_p0 = pnand %p415_p13, %p652_p4  ;;  %s682_s8 = int_to_ptr.vmem [resolvable:$true] %s167_s8 }
  0x16   : > { %s154_s10 = scalar_lea.sflag [#allocation3], %s153_s28  ;;  %s473_s11 = scalar_lea.hbm %s680_s6, 128 }
  0x17   : > { %p474_p3 = scmp.ne.s32.totalorder %s680_s6, %s473_s11  ;;  %p475_p5 = pneg %p686_p0 }
  0x18   : > { %s478_s21 = scalar_lea.hbm %s797_s0, 256  ;;  %p479_p4 = scmp.lt.u32.totalorder %s680_s6, %s797_s0 }
  0x19   : > { %p476_p6 = pnand %p475_p5, %p474_p3  ;;  %p480_p10 = scmp.lt.u32.totalorder %s478_s21, %s473_s11 }
  0x1a   : > { %p482_p12 = scmp.lt.u32.totalorder %s473_s11, %s680_s6 }
  0x1b   : > { %p477_p7 = pneg %p476_p6  ;;  %p481_p13 = por %p480_p10, %p479_p4 }
  0x1d   : > { %p483_p1 = por %p482_p12, %p481_p13 }
  0x1f   : > { %p484_p2 = pnand %p483_p1, %p477_p7 }
  0x21   : > { %487 = shalt.err (!%p484_p2)
}
  0x22   : > { %s488_s28 = scalar_lea.vmem %s682_s8, 128  ;;  %s587_s29 = smov [#allocation2]  }
  0x23   : > { %p489_p3 = scmp.ne.s32.totalorder %s682_s8, %s488_s28  ;;  %s493_s30 = sshll.u32 %s587_s29, 4  ;;  %s494_s30 = int_to_ptr.vmem [resolvable:$false] %s493_s30 }
  0x24   : > { %s495_s4 = scalar_lea.vmem %s494_s30, 256  ;;  %p496_p9 = scmp.lt.s32.totalorder %s682_s8, %s494_s30 }
  0x25   : > { %p491_p6 = pnand %p489_p3, %p475_p5  ;;  %p497_p4 = scmp.lt.s32.totalorder %s495_s4, %s488_s28 }
  0x27   : > { %p492_p11 = pneg %p491_p6  ;;  %p498_p10 = por %p497_p4, %p496_p9 }
  0x29   : > { %p499_p12 = pnand %p498_p10, %p492_p11 }
  0x2b   : > { %502 = shalt.err (!%p499_p12)
}
  0x2c   : > { %410 = dma.hbm_to_vmem [thread:$0]  (!%p686_p0), %s680_s6, 128, %s682_s8, %s154_s10  }
  0x2d   : > { %p807_p1 = scmp.lt.s32.totalorder %s585_s17, 3  ;;  %p808_p2 = scmp.ge.s32.totalorder %s585_s17, 1 }
  0x2f   : > { %p173_p5 = pnand %p808_p2, %p807_p1 }
  0x30   : > { %s722_s5 = sand.u32 (!%p173_p5), 1, %s569_s13  }
  0x31   : > { %176 = sbr.rel (%p173_p5) target bundleno = 209 (0xd1), region = 32  ;;  %s394_s7 = sshll.u32 (!%p173_p5), %s722_s5, 3 }
  0x32   : > { %s179_s11 = scalar_lea.sflag (!%p173_p5), [#allocation3], %s722_s5  ;;  %s182_s9 = scalar_lea.vmem (!%p173_p5), [#allocation2], %s394_s7 }
  0x38   : > { %556 = dma.done.wait (%p658_p8), %s179_s11, 128  }
  0x39   : > { %558 = vsyncadd (%p658_p8), %s179_s11, 4294967168  ;;  %v588_v0 = vmov 0   ;;  %v257_v1 = vld [vmem:[%s798_s1] sm:$0xf]  ;;  %vm211_vm0 = vcmask 1043456   ;;  %v278_v45 = vlaneseq  ;;  %s402_s24 = sshll.u32 %s577_s15, 7 }
  0x3a   : > { %467 = vset.pattern.permute.xlu0 %v588_v0  ;;  %v258_v2 = vld [vmem:[%s799_s2] sm:$0xf]  ;;  %v589_v43 = vmov 839922192   ;;  %s204_s19 = scalar_lea.vmem [#allocation5], %s394_s7  ;;  %s748_s28 = scalar_lea.hbm %s800_s3, %s402_s24 }
  0x3b   : > { %261 = vperm.xlu0 %467, %v257_v1   ;;  %v207_v3 = vld [vmem:[%s182_s9] sm:$0xff]  ;;  %v276_v44 = vunpack.c.l.s4 %v589_v43  ;;  %v279_v48 = vshrl.u32 %v278_v45, 7  ;;  %s302_s21 = sshll.u32 %s204_s19, 4  ;;  %s286_s29 = scalar_lea.sflag [#allocation4], %s722_s5  ;;  %s750_s21 = int_to_ptr.vmem [resolvable:$true] %s302_s21 }
  0x3c   : > { %v209_v4 = vcombine.high %v207_v3, %v207_v3  ;;  %v212_v5 = vsel %vm211_vm0, %v207_v3, 0.0  ;;  %s503_s30 = scalar_lea.vmem %s750_s21, 128  ;;  %p809_p9 = scmp.ne.s32.totalorder %s804_s25, 0 }
  0x3d   : > { %v213_v7 = vrot.slane %v212_v5, 4  ;;  %v277_v47 = vunpack.c.0.s8 %v276_v44  ;;  %p504_p8 = scmp.ne.s32.totalorder %s750_s21, %s503_s30  ;;  %s590_s15 = smov [#allocation5]  }
  0x3e   : > { %v219_v6 = vsel %vm211_vm0, %v209_v4, 0.0  ;;  %s507_s4 = sshll.u32 %s590_s15, 4  ;;  %s508_s4 = int_to_ptr.vmem [resolvable:$false] %s507_s4 }
  0x3f   : > { %273 = vperm.xlu0 %467, %v258_v2   ;;  %v220_v8 = vrot.slane %v219_v6, 4  ;;  %v214_v9 = vadd.f32 %v213_v7, %v212_v5  ;;  %v280_v53 = vsub.s32 %v277_v47, %v279_v48  ;;  %p505_p11 = pnand %p504_p8, %p809_p9  ;;  %s509_s7 = scalar_lea.vmem %s508_s4, 256 }
  0x40   : > { %p510_p7 = scmp.lt.s32.totalorder %s750_s21, %s508_s4  ;;  %p511_p13 = scmp.lt.s32.totalorder %s509_s7, %s503_s30 }
  0x41   : > { %v221_v10 = vadd.f32 %v220_v8, %v219_v6  ;;  %v215_v11 = vrot.slane %v214_v9, 2  ;;  %p506_p0 = pneg %p505_p11 }
  0x42   : > { %p512_p3 = por %p511_p13, %p510_p7 }
  0x43   : > { %v222_v12 = vrot.slane %v221_v10, 2  ;;  %v216_v13 = vadd.f32 %v215_v11, %v214_v9 }
  0x44   : > { %p513_p6 = pnand %p512_p3, %p506_p0 }
  0x45   : > { %v223_v14 = vadd.f32 %v222_v12, %v221_v10  ;;  %v217_v15 = vrot.slane %v216_v13, 1 }
  0x47   : > { %v224_v16 = vrot.slane %v223_v14, 1  ;;  %v218_v17 = vadd.f32 %v217_v15, %v216_v13 }
  0x49   : > { %v225_v18 = vadd.f32 %v224_v16, %v223_v14  ;;  %v226_v19 = vmul.f32 0.25, %v218_v17 }
  0x4b   : > { %v227_v20 = vmul.f32 0.25, %v225_v18 }
  0x4d   : > { %v230_v21 = vcombine.low %v226_v19, %v227_v20 }
  0x4f   : > { %v232_v22 = vsub.f32 %v207_v3, %v230_v21 }
  0x51   : > { %v233_v23 = vmul.f32 %v232_v22, %v232_v22 }
  0x53   : > { %v235_v24 = vcombine.high %v233_v23, %v233_v23  ;;  %v237_v25 = vsel %vm211_vm0, %v233_v23, 0.0 }
  0x54   : > { %v238_v27 = vrot.slane %v237_v25, 4 }
  0x55   : > { %v244_v26 = vsel %vm211_vm0, %v235_v24, 0.0 }
  0x56   : > { %v245_v28 = vrot.slane %v244_v26, 4  ;;  %v239_v29 = vadd.f32 %v238_v27, %v237_v25 }
  0x58   : > { %v246_v30 = vadd.f32 %v245_v28, %v244_v26  ;;  %v240_v31 = vrot.slane %v239_v29, 2 }
  0x5a   : > { %v247_v32 = vrot.slane %v246_v30, 2  ;;  %v241_v33 = vadd.f32 %v240_v31, %v239_v29 }
  0x5c   : > { %v248_v34 = vadd.f32 %v247_v32, %v246_v30  ;;  %v242_v35 = vrot.slane %v241_v33, 1 }
  0x5e   : > { %v249_v36 = vrot.slane %v248_v34, 1  ;;  %v243_v37 = vadd.f32 %v242_v35, %v241_v33 }
  0x60   : > { %v250_v38 = vadd.f32 %v249_v36, %v248_v34  ;;  %v251_v39 = vmul.f32 0.25, %v243_v37 }
  0x62   : > { %v252_v40 = vmul.f32 0.25, %v250_v38  ;;  %v253_v41 = vadd.f32 1e-06, %v251_v39 }
  0x64   : > { %v254_v42 = vadd.f32 1e-06, %v252_v40  ;;  %469 = vrsqrt.f32 %v253_v41 }
  0x66   : > { %471 = vrsqrt.f32 %v254_v42 }
  0x6e   : > { %v470_v46 = vpop.eup %469 }
  0x70   : > { %v472_v49 = vpop.eup %471 }
  0xba   : > { %v262_v50 = vpop.permute.xlu0 %261 }
  0xbb   : > { %v264_v51 = vmul.f32 %v470_v46, %v262_v50  ;;  %v265_v52 = vmul.f32 %v472_v49, %v262_v50 }
  0xbd   : > { %v268_v54 = vcombine.low %v264_v51, %v265_v52 }
  0xbe   : > { %v274_v55 = vpop.permute.xlu0 %273 }
  0xbf   : > { %v270_v56 = vmul.f32 %v268_v54, %v232_v22  ;;  %v281_v57 = vrot.slane %v274_v55, %v280_v53 }
  0xc1   : > { %v283_v58 = vadd.f32 %v281_v57, %v270_v56 }
  0xc3   : > { %284 = vst [vmem:[%s204_s19] sm:$0xff] %v283_v58 }
  0xc4   : > { %516 = shalt.err (!%p513_p6)
}
  0xc5   : > { %s517_s5 = scalar_lea.hbm %s748_s28, 128  ;;  %s521_s6 = scalar_lea.hbm %s800_s3, 256 }
  0xc6   : > { %p518_p4 = scmp.ne.s32.totalorder %s748_s28, %s517_s5  ;;  %p522_p1 = scmp.lt.u32.totalorder %s748_s28, %s800_s3 }
  0xc7   : > { %p523_p2 = scmp.lt.u32.totalorder %s521_s6, %s517_s5  ;;  %p525_p8 = scmp.lt.u32.totalorder %s517_s5, %s748_s28 }
  0xc8   : > { %p519_p10 = pnand %p518_p4, %p809_p9 }
  0xc9   : > { %p524_p5 = por %p523_p2, %p522_p1 }
  0xca   : > { %p520_p12 = pneg %p519_p10 }
  0xcb   : > { %p526_p11 = por %p525_p8, %p524_p5 }
  0xcd   : > { %p527_p0 = pnand %p526_p11, %p520_p12 }
  0xcf   : > { %530 = shalt.err (!%p527_p0)
}
  0xd0   : > { %405 = dma.vmem_to_hbm [thread:$0]  (%p809_p9), %s750_s21, 128, %s748_s28, %s286_s29  }
  0xd1 PF: > { %s314_s18 = sand.u32 1, %s565_s12   ;;  %p810_p7 = scmp.ne.s32.totalorder %s805_s27, 0 }
  0xd2   : > { %p811_p13 = scmp.ge.s32.totalorder %s585_s17, 2  ;;  %s315_s24 = scalar_lea.sflag [#allocation4], %s314_s18 }
  0xd4   : > { %p412_p3 = pnand %p811_p13, %p810_p7 }
  0xd6   : > { %560 = dma.done.wait (!%p412_p3), %s315_s24, 128  }
  0xd7   : > { %562 = vsyncadd (!%p412_p3), %s315_s24, 4294967168  ;;  %s19_s17 = sadd.s32 1, %s585_s17   ;;  %s812_s12 = smov %s569_s13 }
  0xd8   : > { %p16_p6 = scmp.ge.s32.totalorder %s19_s17, 4   ;;  %s813_s13 = smov %s573_s14 }
  0xd9   : > { %s814_s14 = smov %s667_s26  ;;  %s815_s15 = smov %s581_s16 }
  0xda   : > { %s816_s16 = smov %s818_s20  ;;  %18 = sbr.rel (!%p16_p6) target bundleno = 6 (0x6), region = 77 }
  0xe1   :  { %320 = vsyncpa [#allocation3], 1 }
  0xe2   :  { %322 = vsyncpa [#allocation3 + $0x1], 1 }
  0xe3   :  { %323 = vsyncpa [#allocation4], 1 }
  0xe4   :  { %325 = vsyncpa [#allocation4 + $0x1], 1 }

</bundles_post_ra>
